<compile_context>
chip_gen: v6e
topology: v6e:2x2x1
jax: 0.10.0
libtpu: 0.0.40
codegen_flags: <defaults>
</compile_context>

<pallas_src>
import jax
import jax.numpy as jnp
from jax.experimental import pallas as pl
from jax.experimental.pallas import tpu as pltpu


def _make_kernel(precompute_coeff, n_rest):
    def kernel(x_ref, a_ref, dinv_ref,
               w_first_ref, b_first_ref,
               w_rest_ref, b_rest_ref,
               o_ref):
        x = x_ref[...]        # (BB, N, F_in)   compute dtype
        a = a_ref[...]        # (BB, N, N)
        dinv = dinv_ref[...]  # (BB, N, N)
        cdt = x.dtype
        BB, N, _ = x.shape

        # Hoisted, layer-invariant aggregation operator (only when it is cheaper).
        if precompute_coeff:
            coeff = jnp.einsum('bij,bjk->bik', dinv, a,
                               preferred_element_type=jnp.float32).astype(cdt)

        def aggregate(feat):
            # feat: (BB, N, F) in compute dtype; result f32
            if precompute_coeff:
                return jnp.einsum('bij,bjf->bif', coeff, feat,
                                  preferred_element_type=jnp.float32)
            # Reassociated: Dinv @ (A @ feat) -- avoids the O(N^3) coeff matmul.
            agg = jnp.einsum('bij,bjf->bif', a, feat,
                             preferred_element_type=jnp.float32)
            return jnp.einsum('bij,bjf->bif', dinv, agg.astype(cdt),
                              preferred_element_type=jnp.float32)

        def gconv(feat, w_stacked, bias):
            # feat: (BB, N, F)   w_stacked: (2F, F_out)   bias: (1, F_out)
            agg = aggregate(feat)
            # Fused fc + neighbours_fc: [feat | agg] @ [W_fc^T ; W_nb^T] + (b_fc + b_nb)
            cat = jnp.concatenate([feat, agg.astype(cdt)], axis=-1)  # (BB, N, 2F)
            flat = cat.reshape(BB * N, cat.shape[-1])                # tall LHS for MXU
            z = jnp.dot(flat, w_stacked,
                        preferred_element_type=jnp.float32) + bias
            return z.reshape(BB, N, -1)                              # f32

        # first layer (F_in -> F_out) + relu
        feat = gconv(x, w_first_ref[...], b_first_ref[...])
        feat = jnp.maximum(feat, 0.0)

        # hidden layers + last layer (F_out -> F_out); relu on all but the last
        for l in range(n_rest):
            feat = gconv(feat.astype(cdt), w_rest_ref[l], b_rest_ref[l])
            if l < n_rest - 1:
                feat = jnp.maximum(feat, 0.0)

        o_ref[...] = feat.astype(o_ref.dtype)

    return kernel


def _pick_block_b(B, N):
    """Largest divisor of B aiming for BB*N >= 128 rows, while keeping >= 2 grid
    steps when B >= 2 so both v7x TensorCores get work."""
    best = 1
    for bb in range(1, B + 1):
        if B % bb:
            continue
        if B >= 2 and B // bb < 2:
            continue
        best = bb
        if bb * N >= 128:
            break
    return best


def features2features(x, A, Dinv, layers, *, block_b=None, compute_dtype=None):
    """x: (B, N, F_in), A/Dinv: (B, N, N).
    layers: list of (w_fc, b_fc, w_nb, b_nb) with nn.Linear layout (w: (out, in));
            layer 0 maps F_in->F_out, the remaining layers map F_out->F_out.
    compute_dtype: e.g. jnp.bfloat16 on v6e/v7x; accumulation stays f32."""
    B, N, F_in = x.shape
    F_out = layers[0][0].shape[0]
    out_dtype = x.dtype
    cdt = compute_dtype or x.dtype
    n_total = len(layers)

    x_c = x.astype(cdt)
    A_c = A.astype(cdt)
    D_c = Dinv.astype(cdt)

    def stack(w_fc, b_fc, w_nb, b_nb):
        w = jnp.concatenate([w_fc.T, w_nb.T], axis=0).astype(cdt)  # (2*K, F_out)
        b = (b_fc + b_nb).reshape(1, -1).astype(jnp.float32)       # (1, F_out)
        return w, b

    w_first, b_first = stack(*layers[0])
    rest = [stack(*lyr) for lyr in layers[1:]]
    w_rest = jnp.stack([w for w, _ in rest])   # (L, 2*F_out, F_out)
    b_rest = jnp.stack([b for _, b in rest])   # (L, 1, F_out)
    L = len(rest)

    # Static aggregation-strategy choice (exact reorderings of the same math):
    #   precompute coeff once per block:  N^3  + sum_l N^2*F_l   matmul MACs
    #   reassociated Dinv @ (A @ x):            sum_l 2*N^2*F_l
    agg_flops_layers = N * N * (F_in + (n_total - 1) * F_out)
    precompute_coeff = (N ** 3 + agg_flops_layers) <= 2 * agg_flops_layers

    bb = block_b or _pick_block_b(B, N)
    assert B % bb == 0

    grid_spec = pltpu.PrefetchScalarGridSpec(
        num_scalar_prefetch=0,
        grid=(B // bb,),
        in_specs=[
            pl.BlockSpec((bb, N, F_in), lambda i: (i, 0, 0)),          # x
            pl.BlockSpec((bb, N, N), lambda i: (i, 0, 0)),             # A
            pl.BlockSpec((bb, N, N), lambda i: (i, 0, 0)),             # Dinv
            pl.BlockSpec((2 * F_in, F_out), lambda i: (0, 0)),         # stacked W, first
            pl.BlockSpec((1, F_out), lambda i: (0, 0)),                # summed b, first
            pl.BlockSpec((L, 2 * F_out, F_out), lambda i: (0, 0, 0)),  # stacked W, rest
            pl.BlockSpec((L, 1, F_out), lambda i: (0, 0, 0)),          # summed b, rest
        ],
        out_specs=pl.BlockSpec((bb, N, F_out), lambda i: (i, 0, 0)),
    )

    return pl.pallas_call(
        _make_kernel(precompute_coeff, L),
        out_shape=jax.ShapeDtypeStruct((B, N, F_out), out_dtype),
        grid_spec=grid_spec,
        compiler_params=pltpu.CompilerParams(
            dimension_semantics=("parallel",),
            # TODO(synk): for large N on v7x (64 MiB VMEM), tile the node dimension of
            # A/Dinv/x and raise vmem_limit_bytes with headroom.
        ),
    )(x_c, A_c, D_c, w_first, b_first, w_rest, b_rest)


# ----------------------- pure-JAX reference (exact module math) -----------------------
def _graph_conv_ref(x, A, Dinv, w_fc, b_fc, w_nb, b_nb):
    coeff = jnp.einsum('bij,bjk->bik', Dinv, A)
    y = jnp.einsum('bnf,of->bno', x, w_fc) + b_fc
    yn = jnp.einsum('bij,bjf->bif', coeff, x)
    yn = jnp.einsum('bnf,of->bno', yn, w_nb) + b_nb
    return y + yn


def features2features_ref(x, A, Dinv, layers):
    feat = x
    n = len(layers)
    for i, (w_fc, b_fc, w_nb, b_nb) in enumerate(layers):
        feat = _graph_conv_ref(feat, A, Dinv, w_fc, b_fc, w_nb, b_nb)
        if i < n - 1:
            feat = jax.nn.relu(feat)
    return feat


if __name__ == "__main__":
    # Small shapes consistent with the module: B=2 graphs, N=8 nodes,
    # in_features=32, out_features=32, hidden_layer_count=2 (module default).
    B, N, F_in, F_out = 2, 8, 32, 32
    hidden_layer_count = 2
    n_layers = hidden_layer_count + 2  # first + hidden + last

    key = jax.random.PRNGKey(0)
    key, kx = jax.random.split(key)
    x = jax.random.normal(kx, (B, N, F_in), dtype=jnp.float32)

    # Ring-graph adjacency mirroring the module's adjacency_matrix() helper:
    # symmetric A, Dinv = diag(1/degree), repeated across the batch.
    idx = jnp.arange(N)
    A1 = jnp.zeros((N, N), dtype=jnp.float32)
    A1 = A1.at[idx, (idx + 1) % N].set(1.0)
    A1 = A1.at[(idx + 1) % N, idx].set(1.0)
    Dinv1 = jnp.diag(1.0 / jnp.sum(A1, axis=1))
    A = jnp.broadcast_to(A1, (B, N, N))
    Dinv = jnp.broadcast_to(Dinv1, (B, N, N))

    # nn.Linear-style parameters: weight (out, in), bias (out,)
    layers = []
    fan_in = F_in
    for _ in range(n_layers):
        key, k1, k2, k3, k4 = jax.random.split(key, 5)
        bound = 1.0 / (fan_in ** 0.5)
        w_fc = jax.random.uniform(k1, (F_out, fan_in), minval=-bound, maxval=bound, dtype=jnp.float32)
        b_fc = jax.random.uniform(k2, (F_out,), minval=-bound, maxval=bound, dtype=jnp.float32)
        w_nb = jax.random.uniform(k3, (F_out, fan_in), minval=-bound, maxval=bound, dtype=jnp.float32)
        b_nb = jax.random.uniform(k4, (F_out,), minval=-bound, maxval=bound, dtype=jnp.float32)
        layers.append((w_fc, b_fc, w_nb, b_nb))
        fan_in = F_out

    out = features2features(x, A, Dinv, layers)
    out = jax.block_until_ready(out)

    ref = features2features_ref(x, A, Dinv, layers)
    assert out.shape == (B, N, F_out)
    err = jnp.max(jnp.abs(out - ref))
    assert jnp.allclose(out, ref, atol=1e-3, rtol=1e-3), f"mismatch vs reference: max abs err {err}"

    print("KERNEL_OK")
</pallas_src>

<mosaic_0001>
module attributes {stable_mosaic.version = 11 : i64} {
  func.func @kernel(%arg0: i32, %arg1: memref<1x8x32xf32, #tpu.memory_space<vmem>>, %arg2: memref<1x8x8xf32, #tpu.memory_space<vmem>>, %arg3: memref<1x8x8xf32, #tpu.memory_space<vmem>>, %arg4: memref<64x32xf32, #tpu.memory_space<vmem>>, %arg5: memref<1x32xf32, #tpu.memory_space<vmem>>, %arg6: memref<3x64x32xf32, #tpu.memory_space<vmem>>, %arg7: memref<3x1x32xf32, #tpu.memory_space<vmem>>, %arg8: memref<1x8x32xf32, #tpu.memory_space<vmem>>) attributes {dimension_semantics = [#tpu.dimension_semantics<parallel>], iteration_bounds = array<i64: 2>, scalar_prefetch = 0 : i64, scratch_operands = 0 : i64, tpu.core_type = #tpu.core_type<tc>, window_params = [{transform_indices = @transform_0, window_bounds = array<i64: 1, 8, 32>}, {transform_indices = @transform_1, window_bounds = array<i64: 1, 8, 8>}, {transform_indices = @transform_2, window_bounds = array<i64: 1, 8, 8>}, {pipeline_mode = #tpu.pipeline_mode<synchronous>, transform_indices = @transform_3, window_bounds = array<i64: 64, 32>}, {pipeline_mode = #tpu.pipeline_mode<synchronous>, transform_indices = @transform_4, window_bounds = array<i64: 1, 32>}, {pipeline_mode = #tpu.pipeline_mode<synchronous>, transform_indices = @transform_5, window_bounds = array<i64: 3, 64, 32>}, {pipeline_mode = #tpu.pipeline_mode<synchronous>, transform_indices = @transform_6, window_bounds = array<i64: 3, 1, 32>}, {transform_indices = @transform_7, window_bounds = array<i64: 1, 8, 32>}]} {
    %c0 = arith.constant 0 : index
    %c0_0 = arith.constant 0 : index
    %c0_1 = arith.constant 0 : index
    %0 = vector.load %arg1[%c0, %c0_0, %c0_1] : memref<1x8x32xf32, #tpu.memory_space<vmem>>, vector<1x8x32xf32>
    %c0_2 = arith.constant 0 : index
    %c0_3 = arith.constant 0 : index
    %c0_4 = arith.constant 0 : index
    %1 = vector.load %arg2[%c0_2, %c0_3, %c0_4] : memref<1x8x8xf32, #tpu.memory_space<vmem>>, vector<1x8x8xf32>
    %c0_5 = arith.constant 0 : index
    %c0_6 = arith.constant 0 : index
    %c0_7 = arith.constant 0 : index
    %2 = vector.load %arg3[%c0_5, %c0_6, %c0_7] : memref<1x8x8xf32, #tpu.memory_space<vmem>>, vector<1x8x8xf32>
    "tpu.trace_start"() <{level = 10 : i32, message = "bij,bjk->bik"}> : () -> ()
    %cst = arith.constant dense<0.000000e+00> : vector<1x8x8xf32>
    %3 = tpu.matmul %2, %1, %cst {dimension_numbers = #tpu.dot_dimension_numbers<[2], [1], [1], [2], [0, 0, 0, 1, 1, 2], [0], [0]>} : vector<1x8x8xf32>, vector<1x8x8xf32>, vector<1x8x8xf32> -> vector<1x8x8xf32>
    "tpu.trace_stop"() : () -> ()
    %c0_8 = arith.constant 0 : index
    %c0_9 = arith.constant 0 : index
    %4 = vector.load %arg4[%c0_8, %c0_9] : memref<64x32xf32, #tpu.memory_space<vmem>>, vector<64x32xf32>
    %c0_10 = arith.constant 0 : index
    %c0_11 = arith.constant 0 : index
    %5 = vector.load %arg5[%c0_10, %c0_11] : memref<1x32xf32, #tpu.memory_space<vmem>>, vector<1x32xf32>
    "tpu.trace_start"() <{level = 10 : i32, message = "bij,bjf->bif"}> : () -> ()
    %cst_12 = arith.constant dense<0.000000e+00> : vector<1x8x32xf32>
    %6 = tpu.matmul %3, %0, %cst_12 {dimension_numbers = #tpu.dot_dimension_numbers<[2], [1], [1], [2], [0, 0, 0, 1, 1, 2], [0], [0]>} : vector<1x8x8xf32>, vector<1x8x32xf32>, vector<1x8x32xf32> -> vector<1x8x32xf32>
    "tpu.trace_stop"() : () -> ()
    %7 = tpu.concatenate %0, %6 in 2 : vector<1x8x32xf32>, vector<1x8x32xf32> -> vector<1x8x64xf32>
    %8 = vector.shape_cast %7 : vector<1x8x64xf32> to vector<8x64xf32>
    %cst_13 = arith.constant dense<0.000000e+00> : vector<8x32xf32>
    %9 = tpu.matmul %8, %4, %cst_13 {dimension_numbers = #tpu.dot_dimension_numbers<[1], [0], [0], [1], [0, 0, 1, 1], [], []>} : vector<8x64xf32>, vector<64x32xf32>, vector<8x32xf32> -> vector<8x32xf32>
    %10 = vector.broadcast %5 : vector<1x32xf32> to vector<8x32xf32>
    %11 = arith.addf %9, %10 : vector<8x32xf32>
    %12 = vector.shape_cast %11 : vector<8x32xf32> to vector<1x8x32xf32>
    %cst_14 = arith.constant 0.000000e+00 : f32
    %13 = vector.broadcast %cst_14 : f32 to vector<1x8x32xf32>
    %14 = arith.maximumf %12, %13 : vector<1x8x32xf32>
    %c0_15 = arith.constant 0 : index
    %c0_16 = arith.constant 0 : index
    %c0_17 = arith.constant 0 : index
    %15 = vector.load %arg6[%c0_15, %c0_16, %c0_17] : memref<3x64x32xf32, #tpu.memory_space<vmem>>, vector<1x64x32xf32>
    %16 = vector.shape_cast %15 : vector<1x64x32xf32> to vector<64x32xf32>
    %c0_18 = arith.constant 0 : index
    %c0_19 = arith.constant 0 : index
    %c0_20 = arith.constant 0 : index
    %17 = vector.load %arg7[%c0_18, %c0_19, %c0_20] : memref<3x1x32xf32, #tpu.memory_space<vmem>>, vector<1x1x32xf32>
    %18 = vector.shape_cast %17 : vector<1x1x32xf32> to vector<1x32xf32>
    "tpu.trace_start"() <{level = 10 : i32, message = "bij,bjf->bif"}> : () -> ()
    %cst_21 = arith.constant dense<0.000000e+00> : vector<1x8x32xf32>
    %19 = tpu.matmul %3, %14, %cst_21 {dimension_numbers = #tpu.dot_dimension_numbers<[2], [1], [1], [2], [0, 0, 0, 1, 1, 2], [0], [0]>} : vector<1x8x8xf32>, vector<1x8x32xf32>, vector<1x8x32xf32> -> vector<1x8x32xf32>
    "tpu.trace_stop"() : () -> ()
    %20 = tpu.concatenate %14, %19 in 2 : vector<1x8x32xf32>, vector<1x8x32xf32> -> vector<1x8x64xf32>
    %21 = vector.shape_cast %20 : vector<1x8x64xf32> to vector<8x64xf32>
    %cst_22 = arith.constant dense<0.000000e+00> : vector<8x32xf32>
    %22 = tpu.matmul %21, %16, %cst_22 {dimension_numbers = #tpu.dot_dimension_numbers<[1], [0], [0], [1], [0, 0, 1, 1], [], []>} : vector<8x64xf32>, vector<64x32xf32>, vector<8x32xf32> -> vector<8x32xf32>
    %23 = vector.broadcast %18 : vector<1x32xf32> to vector<8x32xf32>
    %24 = arith.addf %22, %23 : vector<8x32xf32>
    %25 = vector.shape_cast %24 : vector<8x32xf32> to vector<1x8x32xf32>
    %cst_23 = arith.constant 0.000000e+00 : f32
    %26 = vector.broadcast %cst_23 : f32 to vector<1x8x32xf32>
    %27 = arith.maximumf %25, %26 : vector<1x8x32xf32>
    %c1 = arith.constant 1 : index
    %c0_24 = arith.constant 0 : index
    %c0_25 = arith.constant 0 : index
    %28 = vector.load %arg6[%c1, %c0_24, %c0_25] : memref<3x64x32xf32, #tpu.memory_space<vmem>>, vector<1x64x32xf32>
    %29 = vector.shape_cast %28 : vector<1x64x32xf32> to vector<64x32xf32>
    %c1_26 = arith.constant 1 : index
    %c0_27 = arith.constant 0 : index
    %c0_28 = arith.constant 0 : index
    %30 = vector.load %arg7[%c1_26, %c0_27, %c0_28] : memref<3x1x32xf32, #tpu.memory_space<vmem>>, vector<1x1x32xf32>
    %31 = vector.shape_cast %30 : vector<1x1x32xf32> to vector<1x32xf32>
    "tpu.trace_start"() <{level = 10 : i32, message = "bij,bjf->bif"}> : () -> ()
    %cst_29 = arith.constant dense<0.000000e+00> : vector<1x8x32xf32>
    %32 = tpu.matmul %3, %27, %cst_29 {dimension_numbers = #tpu.dot_dimension_numbers<[2], [1], [1], [2], [0, 0, 0, 1, 1, 2], [0], [0]>} : vector<1x8x8xf32>, vector<1x8x32xf32>, vector<1x8x32xf32> -> vector<1x8x32xf32>
    "tpu.trace_stop"() : () -> ()
    %33 = tpu.concatenate %27, %32 in 2 : vector<1x8x32xf32>, vector<1x8x32xf32> -> vector<1x8x64xf32>
    %34 = vector.shape_cast %33 : vector<1x8x64xf32> to vector<8x64xf32>
    %cst_30 = arith.constant dense<0.000000e+00> : vector<8x32xf32>
    %35 = tpu.matmul %34, %29, %cst_30 {dimension_numbers = #tpu.dot_dimension_numbers<[1], [0], [0], [1], [0, 0, 1, 1], [], []>} : vector<8x64xf32>, vector<64x32xf32>, vector<8x32xf32> -> vector<8x32xf32>
    %36 = vector.broadcast %31 : vector<1x32xf32> to vector<8x32xf32>
    %37 = arith.addf %35, %36 : vector<8x32xf32>
    %38 = vector.shape_cast %37 : vector<8x32xf32> to vector<1x8x32xf32>
    %cst_31 = arith.constant 0.000000e+00 : f32
    %39 = vector.broadcast %cst_31 : f32 to vector<1x8x32xf32>
    %40 = arith.maximumf %38, %39 : vector<1x8x32xf32>
    %c2 = arith.constant 2 : index
    %c0_32 = arith.constant 0 : index
    %c0_33 = arith.constant 0 : index
    %41 = vector.load %arg6[%c2, %c0_32, %c0_33] : memref<3x64x32xf32, #tpu.memory_space<vmem>>, vector<1x64x32xf32>
    %42 = vector.shape_cast %41 : vector<1x64x32xf32> to vector<64x32xf32>
    %c2_34 = arith.constant 2 : index
    %c0_35 = arith.constant 0 : index
    %c0_36 = arith.constant 0 : index
    %43 = vector.load %arg7[%c2_34, %c0_35, %c0_36] : memref<3x1x32xf32, #tpu.memory_space<vmem>>, vector<1x1x32xf32>
    %44 = vector.shape_cast %43 : vector<1x1x32xf32> to vector<1x32xf32>
    "tpu.trace_start"() <{level = 10 : i32, message = "bij,bjf->bif"}> : () -> ()
    %cst_37 = arith.constant dense<0.000000e+00> : vector<1x8x32xf32>
    %45 = tpu.matmul %3, %40, %cst_37 {dimension_numbers = #tpu.dot_dimension_numbers<[2], [1], [1], [2], [0, 0, 0, 1, 1, 2], [0], [0]>} : vector<1x8x8xf32>, vector<1x8x32xf32>, vector<1x8x32xf32> -> vector<1x8x32xf32>
    "tpu.trace_stop"() : () -> ()
    %46 = tpu.concatenate %40, %45 in 2 : vector<1x8x32xf32>, vector<1x8x32xf32> -> vector<1x8x64xf32>
    %47 = vector.shape_cast %46 : vector<1x8x64xf32> to vector<8x64xf32>
    %cst_38 = arith.constant dense<0.000000e+00> : vector<8x32xf32>
    %48 = tpu.matmul %47, %42, %cst_38 {dimension_numbers = #tpu.dot_dimension_numbers<[1], [0], [0], [1], [0, 0, 1, 1], [], []>} : vector<8x64xf32>, vector<64x32xf32>, vector<8x32xf32> -> vector<8x32xf32>
    %49 = vector.broadcast %44 : vector<1x32xf32> to vector<8x32xf32>
    %50 = arith.addf %48, %49 : vector<8x32xf32>
    %51 = vector.shape_cast %50 : vector<8x32xf32> to vector<1x8x32xf32>
    %c0_39 = arith.constant 0 : index
    %c0_40 = arith.constant 0 : index
    %c0_41 = arith.constant 0 : index
    %52 = vector.load %arg8[%c0_39, %c0_40, %c0_41] : memref<1x8x32xf32, #tpu.memory_space<vmem>>, vector<1x8x32xf32>
    tpu.vector_store %arg8[%c0_39, %c0_40, %c0_41], %51 {strides = array<i32>} : memref<1x8x32xf32, #tpu.memory_space<vmem>>, vector<1x8x32xf32>,
    return
  }
  func.func @transform_0(%arg0: i32) -> (i32, i32, i32) {
    %c0_i32 = arith.constant 0 : i32
    %c0_i32_0 = arith.constant 0 : i32
    %c0_i32_1 = arith.constant 0 : i32
    return %arg0, %c0_i32, %c0_i32_0 : i32, i32, i32
  }
  func.func @transform_1(%arg0: i32) -> (i32, i32, i32) {
    %c0_i32 = arith.constant 0 : i32
    %c0_i32_0 = arith.constant 0 : i32
    %c0_i32_1 = arith.constant 0 : i32
    return %arg0, %c0_i32, %c0_i32_0 : i32, i32, i32
  }
  func.func @transform_2(%arg0: i32) -> (i32, i32, i32) {
    %c0_i32 = arith.constant 0 : i32
    %c0_i32_0 = arith.constant 0 : i32
    %c0_i32_1 = arith.constant 0 : i32
    return %arg0, %c0_i32, %c0_i32_0 : i32, i32, i32
  }
  func.func @transform_3(%arg0: i32) -> (i32, i32) {
    %c0_i32 = arith.constant 0 : i32
    %c0_i32_0 = arith.constant 0 : i32
    %c0_i32_1 = arith.constant 0 : i32
    return %c0_i32, %c0_i32_0 : i32, i32
  }
  func.func @transform_4(%arg0: i32) -> (i32, i32) {
    %c0_i32 = arith.constant 0 : i32
    %c0_i32_0 = arith.constant 0 : i32
    %c0_i32_1 = arith.constant 0 : i32
    return %c0_i32, %c0_i32_0 : i32, i32
  }
  func.func @transform_5(%arg0: i32) -> (i32, i32, i32) {
    %c0_i32 = arith.constant 0 : i32
    %c0_i32_0 = arith.constant 0 : i32
    %c0_i32_1 = arith.constant 0 : i32
    %c0_i32_2 = arith.constant 0 : i32
    return %c0_i32, %c0_i32_0, %c0_i32_1 : i32, i32, i32
  }
  func.func @transform_6(%arg0: i32) -> (i32, i32, i32) {
    %c0_i32 = arith.constant 0 : i32
    %c0_i32_0 = arith.constant 0 : i32
    %c0_i32_1 = arith.constant 0 : i32
    %c0_i32_2 = arith.constant 0 : i32
    return %c0_i32, %c0_i32_0, %c0_i32_1 : i32, i32, i32
  }
  func.func @transform_7(%arg0: i32) -> (i32, i32, i32) {
    %c0_i32 = arith.constant 0 : i32
    %c0_i32_0 = arith.constant 0 : i32
    %c0_i32_1 = arith.constant 0 : i32
    return %arg0, %c0_i32, %c0_i32_0 : i32, i32, i32
  }
}

</mosaic_0001>

<bundles_post_ra>
// kernel: tpu_custom_call.1
= control target key start
LH: loop header
LB: loop body
LE: loop exit
PB: predicated region body
PF: predicated region fallthrough
CT: control target
= control target key end

     0   :  { %12 = vsyncpa [#allocation3], 0  ;;  %s1771_s0 = inlined_call_operand.vmem [shape: f32[2,8,32], index: 0, kind: input, shape index: {}]   ;;  %s1772_s1 = inlined_call_operand.vmem [shape: f32[2,8,8], index: 1, kind: input, shape index: {}]   ;;  %s1773_s2 = inlined_call_operand.vmem [shape: f32[2,8,8], index: 2, kind: input, shape index: {}]   ;;  %s1774_s3 = inlined_call_operand.vmem [shape: f32[64,32], index: 3, kind: input, shape index: {}]   ;;  %s1775_s4 = inlined_call_operand.vmem [shape: f32[1,32], index: 4, kind: input, shape index: {}]   ;;  %s1776_s5 = inlined_call_operand.vmem [shape: f32[3,64,32], index: 5, kind: input, shape index: {}]   ;;  %s1777_s6 = inlined_call_operand.vmem [shape: f32[3,1,32], index: 6, kind: input, shape index: {}]   ;;  %s1778_s7 = inlined_call_operand.hbm [shape: f32[2,8,32], index: 7, kind: output, shape index: {}]  }
   0x1   :  { %14 = vsyncpa [#allocation3 + $0x1], 0  ;;  %s1485_s24 = smov 0   ;;  %s1487_s25 = smov 0  }
   0x2   :  { %s1489_s26 = smov 0   ;;  %s1491_s27 = smov 0  }
   0x3 LB: > { %s1506_s28 = sadd.s32 4294967295, %s1439_s27   ;;  %s1147_s29 = sadd.s32 4294967294, %s1439_s27   ;;  %s1439_s27 = sphi %s1491_s27, %s1784_s27   ;;  %s1435_s26 = sphi %s1489_s26, %s1783_s26   ;;  %s1431_s25 = sphi %s1487_s25, %s1782_s25   ;;  %s1427_s24 = sphi %s1485_s24, %s1781_s24  }
   0x4   : > { %s1510_s30 = sadd.s32 1, %s1439_s27   ;;  %s189_s8 = sadd.s32 1, %s1435_s26 }
   0x5   : > { %s186_s9 = ssub.s32 %s1439_s27, %s1510_s30  ;;  %p199_p0 = scmp.ne.s32.totalorder %s1435_s26, %s1431_s25 }
   0x6   : > { %p187_p1 = scmp.eq.s32.totalorder %s186_s9, 0  ;;  %p200_p2 = scmp.eq.s32.totalorder %s1506_s28, 1 }
   0x7   : > { %p205_p3 = scmp.ne.s32.totalorder %s1431_s25, %s1427_s24  ;;  %p206_p4 = scmp.eq.s32.totalorder %s1147_s29, 1 }
   0x8   : > { %s1521_s10 = scalar_select %p187_p1, %s1435_s26, %s189_s8  }
   0x9   : > { %p1523_p5 = por %p200_p2, %p199_p0  ;;  %p1527_p6 = por %p206_p4, %p205_p3 }
   0xa   : > { %p1150_p7 = scmp.ge.s32.totalorder %s1439_s27, 1  ;;  %p257_p8 = scmp.lt.s32.totalorder %s1439_s27, 3 }
   0xc   : > { %p258_p9 = pnand %p1150_p7, %p257_p8 }
   0xd   : > { %p296_p10 = scmp.lt.s32.totalorder (!%p258_p9), %s1506_s28, 1  ;;  %s1443_s9 = smov (!%p258_p9), 32  }
   0xe   : > { %261 = sbr.rel (%p258_p9) target bundleno = 2256 (0x8d0), region = 48  ;;  %s293_s15 = sand.u32 (!%p258_p9), 1, %s1431_s25  }
   0xf   : > { %s1151_s16 = sshll.u32 (!%p258_p9), %s293_s15, 3  ;;  %s1187_s19 = sshll.u32 (!%p258_p9), %s1506_s28, 7 }
  0x10   : > { %s1051_s29 = scalar_lea.sflag (!%p258_p9), [#allocation3], %s293_s15 }
  0x13   : > { %v1441_v0 = vmov 0.0   ;;  %vm1442_vm0 = vmmov 0   ;;  %s297_s13 = scalar_select %p296_p10, %s1506_s28, 1  ;;  %vm311_vm1 = vcmask 64512   ;;  %v392_v6 = vld [vmem:[%s1774_s3 + $0x38] sm:$0xff]  ;;  %v391_v7 = vld [vmem:[%s1774_s3 + $0x30] sm:$0xff] }
  0x14   : > { %1236 = vmatprep.subr.mxu0 %v1441_v0  ;;  %1238 = vmatprep.mubr.msk.f32.mxu0 %vm1442_vm0, %v1441_v0  ;;  %v390_v8 = vld [vmem:[%s1774_s3 + $0x28] sm:$0xff]  ;;  %v389_v9 = vld [vmem:[%s1774_s3 + $0x20] sm:$0xff]  ;;  %v388_v10 = vld [vmem:[%s1774_s3 + $0x18] sm:$0xff]  ;;  %vm471_vm2 = vcmask 261120   ;;  %vm479_vm3 = vcmask 523264   ;;  %s1444_s28 = smov [#allocation2]  }
  0x15   : > { %1241 = vmatprep.subr.mxu1 %v1441_v0  ;;  %1243 = vmatprep.mubr.msk.f32.mxu1 %vm1442_vm0, %v1441_v0  ;;  %s1152_s14 = sshll.u32 %s297_s13, 3  ;;  %v387_v11 = vld [vmem:[%s1774_s3 + $0x10] sm:$0xff]  ;;  %v386_v12 = vld [vmem:[%s1774_s3 + $0x8] sm:$0xff]  ;;  %v385_v13 = vld [vmem:[%s1774_s3] sm:$0xff]  ;;  %s1383_s13 = sshll.u32 %s1444_s28, 4  ;;  %s1384_s13 = int_to_ptr.vmem [resolvable:$false] %s1383_s13 }
  0x16   : > { %s303_s17 = scalar_lea.vmem %s1772_s1, %s1152_s14  ;;  %s307_s20 = scalar_lea.vmem %s1773_s2, %s1152_s14  ;;  %v1157_v18 = vld [vmem:[%s1775_s4] ss:$0 sm:$0xff]  ;;  %v561_v23 = vld [vmem:[%s1776_s5 + $0x38] sm:$0xff]  ;;  %v560_v24 = vld [vmem:[%s1776_s5 + $0x30] sm:$0xff] }
  0x17   : > { %v309_v1 = vld [vmem:[%s303_s17] sm:$0xff]  ;;  %s299_s23 = scalar_lea.vmem %s1771_s0, %s1152_s14  ;;  %v559_v25 = vld [vmem:[%s1776_s5 + $0x28] sm:$0xff]  ;;  %v557_v27 = vld [vmem:[%s1776_s5 + $0x18] sm:$0xff]  ;;  %s1385_s14 = scalar_lea.vmem %s1384_s13, 256 }
  0x18   : > { %v310_v2 = vld [vmem:[%s307_s20] sm:$0xff]  ;;  %1237 = vmatpush3.msra.mxu0 %v309_v1  ;;  %v556_v28 = vld [vmem:[%s1776_s5 + $0x10] sm:$0xff]  ;;  %v555_v29 = vld [vmem:[%s1776_s5 + $0x8] sm:$0xff]  ;;  %s295_s20 = scalar_lea.vmem [#allocation2], %s1151_s16 }
  0x19   : > { %1239 = vmatmul.mubr.msk.f32.vlgmr.msra.gmra.mxu0 %vm311_vm1, %v310_v2  ;;  %1246 = vmatprep.subr.mxu0 %v1441_v0  ;;  %v308_v3 = vld [vmem:[%s299_s23] sm:$0xff]  ;;  %v1169_v40 = vld [vmem:[%s1776_s5 + $0x78] sm:$0xff]  ;;  %v1168_v41 = vld [vmem:[%s1776_s5 + $0x70] sm:$0xff]  ;;  %s1064_s21 = sshll.u32 %s295_s20, 4  ;;  %s1735_s23 = scalar_lea.hbm %s1778_s7, %s1187_s19  ;;  %s1065_s21 = int_to_ptr.vmem [resolvable:$true] %s1064_s21 }
  0x1a   : > { %1262 = vmatprep.mubr.msk.f32.mxu0 %vm1442_vm0, %v1441_v0  ;;  %1242 = vmatpush3.msra.mxu1 %v308_v3  ;;  %v558_v26 = vld [vmem:[%s1776_s5 + $0x20] sm:$0xff]  ;;  %v1167_v42 = vld [vmem:[%s1776_s5 + $0x68] sm:$0xff]  ;;  %v1165_v44 = vld [vmem:[%s1776_s5 + $0x58] sm:$0xff]  ;;  %s1379_s8 = scalar_lea.vmem %s1065_s21, 128  ;;  %p1386_p0 = scmp.lt.s32.totalorder %s1065_s21, %s1384_s13 }
  0x1b   : > { %1265 = vmatprep.subr.mxu1 %v1441_v0  ;;  %1247 = vmatpush3.msra.mxu0 %v392_v6  ;;  %v554_v30 = vld [vmem:[%s1776_s5] sm:$0xff]  ;;  %v1164_v45 = vld [vmem:[%s1776_s5 + $0x50] sm:$0xff]  ;;  %v1163_v46 = vld [vmem:[%s1776_s5 + $0x48] sm:$0xff]  ;;  %p1380_p11 = scmp.ne.s32.totalorder %s1065_s21, %s1379_s8  ;;  %p1387_p1 = scmp.lt.s32.totalorder %s1385_s14, %s1379_s8 }
  0x1c   : > { %1248 = vmatprep.subr.mxu0 %v1441_v0  ;;  %v1160_v35 = vld [vmem:[%s1777_s6] ss:$0 sm:$0xff]  ;;  %v1172_v52 = vld [vmem:[%s1777_s6 + $0x1] ss:$0 sm:$0xff]  ;;  %v1181_v57 = vld [vmem:[%s1776_s5 + $0xb8] sm:$0xff] }
  0x1d   : > { %1249 = vmatpush3.msra.mxu0 %v391_v7  ;;  %v1166_v43 = vld [vmem:[%s1776_s5 + $0x60] sm:$0xff]  ;;  %v1180_v58 = vld [vmem:[%s1776_s5 + $0xb0] sm:$0xff]  ;;  %v1179_v59 = vld [vmem:[%s1776_s5 + $0xa8] sm:$0xff]  ;;  %p1381_p12 = pnand %p1380_p11, %p1523_p5  ;;  %p1388_p2 = por %p1387_p1, %p1386_p0 }
  0x1e   : > { %1250 = vmatprep.subr.mxu0 %v1441_v0  ;;  %v1162_v47 = vld [vmem:[%s1776_s5 + $0x40] sm:$0xff]  ;;  %v1177_v61 = vld [vmem:[%s1776_s5 + $0x98] sm:$0xff]  ;;  %v1176_v62 = vld [vmem:[%s1776_s5 + $0x90] sm:$0xff] }
  0x1f   : > { %1251 = vmatpush3.msra.mxu0 %v390_v8  ;;  %v1178_v60 = vld [vmem:[%s1776_s5 + $0xa0] sm:$0xff]  ;;  %v1175_v63 = vld [vmem:[%s1776_s5 + $0x88] sm:$0xff]  ;;  %p1382_p13 = pneg %p1381_p12 }
  0x20   : > { %1252 = vmatprep.subr.mxu0 %v1441_v0  ;;  %v1174_v1 = vld [vmem:[%s1776_s5 + $0x80] sm:$0xff] }
  0x21   : > { %1253 = vmatpush3.msra.mxu0 %v389_v9  ;;  %p1389_p3 = pnand %p1388_p2, %p1382_p13 }
  0x22   : > { %1254 = vmatprep.subr.mxu0 %v1441_v0 }
  0x23   : > { %1255 = vmatpush3.msra.mxu0 %v388_v10 }
  0x24   : > { %1256 = vmatprep.subr.mxu0 %v1441_v0 }
  0x25   : > { %1257 = vmatpush3.msra.mxu0 %v387_v11 }
  0x26   : > { %1258 = vmatprep.subr.mxu0 %v1441_v0 }
  0x27   : > { %1259 = vmatpush3.msra.mxu0 %v386_v12 }
  0x28   : > { %1260 = vmatprep.subr.mxu0 %v1441_v0 }
  0x29   : > { %1261 = vmatpush3.msra.mxu0 %v385_v13 }
  0x2a   : > { %1289 = vmatprep.subr.mxu0 %v1441_v0 }
  0xd9   : > { %v1555_v4 = vpop.f32.mrf.mxu0 }
  0xda   : > { %1244 = vmatmul.mubr.msk.f32.vlgmr.msra.gmra.mxu1 %vm311_vm1, %v1555_v4 }
  0xdb   : > { %v1240_v5 = vpop.f32.mrf.mxu0  ;;  %1267 = vmatprep.mubr.msk.f32.mxu1 %vm1442_vm0, %v1441_v0 }
 0x19a   : > { %v463_v14 = vpop.f32.mrf.mxu1 }
 0x19b   : > { %468 = vrot.lane.b32.xlu0 %v463_v14, %s1443_s9 }
 0x19c   : > { %v1245_v15 = vpop.f32.mrf.mxu1 }
 0x20d   : > { %v469_v16 = vpop.permute.xlu0 %468 }
 0x20e   : > { %v472_v17 = vsel %vm471_vm2, %v308_v3, %v469_v16 }
 0x20f   : > { %1263 = vmatmul.mubr.msk.f32.vlgmr.msra.gmra.mxu0 %vm479_vm3, %v472_v17 }
 0x210   : > { %1291 = vmatprep.mubr.msk.f32.mxu0 %vm1442_vm0, %v1441_v0 }
 0x2cf   : > { %v549_v19 = vpop.f32.mrf.mxu0 }
 0x2d0   : > { %v550_v20 = vadd.f32 %v1157_v18, %v549_v19 }
 0x2d1   : > { %v1264_v21 = vpop.f32.mrf.mxu0 }
 0x2d2   : > { %v553_v22 = vmax.f32 %v550_v20, 0.0 }
 0x2d4   : > { %1266 = vmatpush3.msra.mxu1 %v553_v22 }
 0x2d5   : > { %1268 = vmatmul.mubr.msk.f32.vlgmr.msra.gmra.mxu1 %vm311_vm1, %v1555_v4  ;;  %1270 = vmatprep.subr.mxu1 %v1441_v0 }
 0x2d6   : > { %1286 = vmatprep.mubr.msk.f32.mxu1 %vm1442_vm0, %v1441_v0  ;;  %1271 = vmatpush3.msra.mxu1 %v561_v23 }
 0x2d7   : > { %1272 = vmatprep.subr.mxu1 %v1441_v0 }
 0x2d8   : > { %1273 = vmatpush3.msra.mxu1 %v560_v24 }
 0x2d9   : > { %1274 = vmatprep.subr.mxu1 %v1441_v0 }
 0x2da   : > { %1275 = vmatpush3.msra.mxu1 %v559_v25 }
 0x2db   : > { %1276 = vmatprep.subr.mxu1 %v1441_v0 }
 0x2dc   : > { %1277 = vmatpush3.msra.mxu1 %v558_v26 }
 0x2dd   : > { %1278 = vmatprep.subr.mxu1 %v1441_v0 }
 0x2de   : > { %1279 = vmatpush3.msra.mxu1 %v557_v27 }
 0x2df   : > { %1280 = vmatprep.subr.mxu1 %v1441_v0 }
 0x2e0   : > { %1281 = vmatpush3.msra.mxu1 %v556_v28 }
 0x2e1   : > { %1282 = vmatprep.subr.mxu1 %v1441_v0 }
 0x2e2   : > { %1283 = vmatpush3.msra.mxu1 %v555_v29 }
 0x2e3   : > { %1284 = vmatprep.subr.mxu1 %v1441_v0 }
 0x2e4   : > { %1285 = vmatpush3.msra.mxu1 %v554_v30 }
 0x2e5   : > { %1313 = vmatprep.subr.mxu1 %v1441_v0 }
 0x395   : > { %v629_v31 = vpop.f32.mrf.mxu1 }
 0x396   : > { %634 = vrot.lane.b32.xlu0 %v629_v31, %s1443_s9 }
 0x397   : > { %v1269_v32 = vpop.f32.mrf.mxu1 }
 0x408   : > { %v635_v33 = vpop.permute.xlu0 %634 }
 0x409   : > { %v637_v34 = vsel %vm471_vm2, %v553_v22, %v635_v33 }
 0x40a   : > { %1287 = vmatmul.mubr.msk.f32.vlgmr.msra.gmra.mxu1 %vm479_vm3, %v637_v34 }
 0x40b   : > { %1315 = vmatprep.mubr.msk.f32.mxu1 %vm1442_vm0, %v1441_v0 }
 0x4ca   : > { %v713_v36 = vpop.f32.mrf.mxu1 }
 0x4cb   : > { %v714_v37 = vadd.f32 %v1160_v35, %v713_v36 }
 0x4cc   : > { %v1288_v38 = vpop.f32.mrf.mxu1 }
 0x4cd   : > { %v717_v39 = vmax.f32 %v714_v37, 0.0 }
 0x4cf   : > { %1290 = vmatpush3.msra.mxu0 %v717_v39 }
 0x4d0   : > { %1292 = vmatmul.mubr.msk.f32.vlgmr.msra.gmra.mxu0 %vm311_vm1, %v1555_v4  ;;  %1294 = vmatprep.subr.mxu0 %v1441_v0 }
 0x4d1   : > { %1310 = vmatprep.mubr.msk.f32.mxu0 %vm1442_vm0, %v1441_v0  ;;  %1295 = vmatpush3.msra.mxu0 %v1169_v40 }
 0x4d2   : > { %1296 = vmatprep.subr.mxu0 %v1441_v0 }
 0x4d3   : > { %1297 = vmatpush3.msra.mxu0 %v1168_v41 }
 0x4d4   : > { %1298 = vmatprep.subr.mxu0 %v1441_v0 }
 0x4d5   : > { %1299 = vmatpush3.msra.mxu0 %v1167_v42 }
 0x4d6   : > { %1300 = vmatprep.subr.mxu0 %v1441_v0 }
 0x4d7   : > { %1301 = vmatpush3.msra.mxu0 %v1166_v43 }
 0x4d8   : > { %1302 = vmatprep.subr.mxu0 %v1441_v0 }
 0x4d9   : > { %1303 = vmatpush3.msra.mxu0 %v1165_v44 }
 0x4da   : > { %1304 = vmatprep.subr.mxu0 %v1441_v0 }
 0x4db   : > { %1305 = vmatpush3.msra.mxu0 %v1164_v45 }
 0x4dc   : > { %1306 = vmatprep.subr.mxu0 %v1441_v0 }
 0x4dd   : > { %1307 = vmatpush3.msra.mxu0 %v1163_v46 }
 0x4de   : > { %1308 = vmatprep.subr.mxu0 %v1441_v0 }
 0x4df   : > { %1309 = vmatpush3.msra.mxu0 %v1162_v47 }
 0x590   : > { %v795_v48 = vpop.f32.mrf.mxu0 }
 0x591   : > { %800 = vrot.lane.b32.xlu1 %v795_v48, %s1443_s9 }
 0x592   : > { %v1293_v49 = vpop.f32.mrf.mxu0 }
 0x603   : > { %v801_v50 = vpop.permute.xlu1 %800 }
 0x604   : > { %v803_v51 = vsel %vm471_vm2, %v717_v39, %v801_v50 }
 0x605   : > { %1311 = vmatmul.mubr.msk.f32.vlgmr.msra.gmra.mxu0 %vm479_vm3, %v803_v51 }
 0x6c5   : > { %v879_v53 = vpop.f32.mrf.mxu0 }
 0x6c6   : > { %v880_v54 = vadd.f32 %v1172_v52, %v879_v53 }
 0x6c7   : > { %v1312_v55 = vpop.f32.mrf.mxu0 }
 0x6c8   : > { %v883_v56 = vmax.f32 %v880_v54, 0.0 }
 0x6ca   : > { %1314 = vmatpush3.msra.mxu1 %v883_v56 }
 0x6cb   : > { %1316 = vmatmul.mubr.msk.f32.vlgmr.msra.gmra.mxu1 %vm311_vm1, %v1555_v4  ;;  %1318 = vmatprep.subr.mxu1 %v1441_v0 }
 0x6cc   : > { %1334 = vmatprep.mubr.msk.f32.mxu1 %vm1442_vm0, %v1441_v0  ;;  %1319 = vmatpush3.msra.mxu1 %v1181_v57 }
 0x6cd   : > { %1320 = vmatprep.subr.mxu1 %v1441_v0 }
 0x6ce   : > { %1321 = vmatpush3.msra.mxu1 %v1180_v58 }
 0x6cf   : > { %1322 = vmatprep.subr.mxu1 %v1441_v0 }
 0x6d0   : > { %1323 = vmatpush3.msra.mxu1 %v1179_v59 }
 0x6d1   : > { %1324 = vmatprep.subr.mxu1 %v1441_v0 }
 0x6d2   : > { %1325 = vmatpush3.msra.mxu1 %v1178_v60 }
 0x6d3   : > { %1326 = vmatprep.subr.mxu1 %v1441_v0 }
 0x6d4   : > { %1327 = vmatpush3.msra.mxu1 %v1177_v61 }
 0x6d5   : > { %1328 = vmatprep.subr.mxu1 %v1441_v0 }
 0x6d6   : > { %1329 = vmatpush3.msra.mxu1 %v1176_v62 }
 0x6d7   : > { %1330 = vmatprep.subr.mxu1 %v1441_v0 }
 0x6d8   : > { %1331 = vmatpush3.msra.mxu1 %v1175_v63 }
 0x6d9   : > { %1332 = vmatprep.subr.mxu1 %v1441_v0  ;;  %v1184_v0 = vld [vmem:[%s1777_s6 + $0x2] ss:$0 sm:$0xff] }
 0x6da   : > { %1333 = vmatpush3.msra.mxu1 %v1174_v1 }
 0x78b   : > { %v961_v2 = vpop.f32.mrf.mxu1 }
 0x78c   : > { %966 = vrot.lane.b32.xlu1 %v961_v2, %s1443_s9 }
 0x78d   : > { %v1317_v3 = vpop.f32.mrf.mxu1 }
 0x7fe   : > { %v967_v4 = vpop.permute.xlu1 %966 }
 0x7ff   : > { %v969_v5 = vsel %vm471_vm2, %v883_v56, %v967_v4 }
 0x800   : > { %1335 = vmatmul.mubr.msk.f32.vlgmr.msra.gmra.mxu1 %vm479_vm3, %v969_v5 }
 0x8c0   : > { %v1045_v6 = vpop.f32.mrf.mxu1 }
 0x8c1   : > { %v1046_v7 = vadd.f32 %v1184_v0, %v1045_v6 }
 0x8c2   : > { %v1336_v8 = vpop.f32.mrf.mxu1 }
 0x8c3   : > { %1049 = vst.msk [vmem:[%s295_s20] sm:$0xff] %vm471_vm2, %v1046_v7 }
 0x8c4   : > { %1392 = shalt.err (!%p1389_p3)
}
 0x8c5   : > { %s1393_s16 = scalar_lea.hbm %s1735_s23, 128  ;;  %s1397_s18 = scalar_lea.hbm %s1778_s7, 256 }
 0x8c6   : > { %p1394_p4 = scmp.ne.s32.totalorder %s1735_s23, %s1393_s16  ;;  %p1398_p9 = scmp.lt.s32.totalorder %s1735_s23, %s1778_s7 }
 0x8c7   : > { %p1399_p10 = scmp.lt.s32.totalorder %s1397_s18, %s1393_s16 }
 0x8c8   : > { %p1395_p7 = pnand %p1394_p4, %p1523_p5 }
 0x8c9   : > { %p1400_p11 = por %p1399_p10, %p1398_p9 }
 0x8ca   : > { %p1396_p8 = pneg %p1395_p7 }
 0x8cc   : > { %p1401_p12 = pnand %p1400_p11, %p1396_p8 }
 0x8ce   : > { %1404 = shalt.err (!%p1401_p12)
}
 0x8cf   : > { %1337 = dma.vmem_to_hbm [thread:$0]  (%p1523_p5), %s1065_s21, 128, %s1735_s23, %s1051_s29  }
 0x8d0 PF: > { %p1343_p13 = scmp.ge.s32.totalorder %s1439_s27, 2  ;;  %s1076_s22 = sand.u32 1, %s1427_s24  }
 0x8d1   : > { %s1077_s9 = scalar_lea.sflag [#allocation3], %s1076_s22 }
 0x8d2   : > { %p1340_p0 = pnand %p1343_p13, %p1527_p6 }
 0x8d4   : > { %p1341_p1 = pneg %p1340_p0 }
 0x8d6   : > { %1422 = dma.done.wait (%p1341_p1), %s1077_s9, 128  }
 0x8d7   : > { %1424 = vsyncadd (%p1341_p1), %s1077_s9, 4294967168  ;;  %p17_p2 = scmp.ge.s32.totalorder %s1510_s30, 4   ;;  %s1781_s24 = smov %s1431_s25 }
 0x8d8   : > { %s1782_s25 = smov %s1435_s26  ;;  %s1783_s26 = smov %s1521_s10 }
 0x8d9   : > { %s1784_s27 = smov %s1510_s30  ;;  %19 = sbr.rel (!%p17_p2) target bundleno = 3 (0x3), region = 93 }
 0x8de   :  { %1082 = vsyncpa [#allocation3], 1 }
 0x8df   :  { %1084 = vsyncpa [#allocation3 + $0x1], 1 }

</bundles_post_ra>
